<compile_context>
chip_gen: v5e
topology: v5e:2x2
jax: 0.10.0
libtpu: 0.0.40
codegen_flags: <defaults>
</compile_context>

<pallas_src>
import functools
import math

import jax
import jax.numpy as jnp
from jax import lax
from jax.experimental import pallas as pl
from jax.experimental.pallas import tpu as pltpu

_MASK_VALUE = -1e4  # GPT-2 style large negative for causal / padding masking


@functools.lru_cache(maxsize=None)
def _vmem_limit_bytes():
    """Generation-aware VMEM budget (v5e/v6e: ~100 MiB of 128; v7x: ~54 MiB of 64)."""
    try:
        cap = pltpu.get_tpu_info().vmem_capacity_bytes
    except Exception:
        cap = 64 * 1024 * 1024
    return int(min(cap * 0.85, 100 * 1024 * 1024))


def _pick_seq_tile(s, candidates=(512, 256, 128)):
    # TODO(synk): non-multiple-of-128 long sequences fall back to a single full-S tile;
    # a padding / remainder-tile path would be needed for those.
    for t in candidates:
        if s % t == 0:
            return t
    return s


def _pick_head_block(h, d):
    """Largest divisor of H with hb*D <= 128-ish (keeps blocks modest, cuts grid steps)."""
    target = max(1, 128 // max(d, 1))
    hb = 1
    for cand in range(1, h + 1):
        if h % cand == 0 and cand <= target:
            hb = cand
    return hb


# --------------------------- fused QKV projection kernel ---------------------------
# grid (B, S_tiles, H); x tile resident across the inner head axis; per-head weight
# slab [E, 3D] read from a fully-resident [H, E, 3D] bf16 block; outputs written
# directly as [B, H, S, D] (no XLA head-split transpose afterwards).

def _qkv_proj_kernel(x_ref, w_ref, b_ref, q_out, k_out, v_out):
    h = pl.program_id(2)
    d = q_out.shape[-1]
    x = x_ref[...].astype(jnp.bfloat16)                       # [s_tile, E]
    acc = jnp.dot(x, w_ref[h], preferred_element_type=jnp.float32)   # [s_tile, 3D]
    acc = acc + b_ref[h].astype(jnp.float32)
    q_out[...] = acc[:, :d].astype(q_out.dtype)
    k_out[...] = acc[:, d:2 * d].astype(k_out.dtype)
    v_out[...] = acc[:, 2 * d:].astype(v_out.dtype)


def _qkv_projection(x, w_heads, b_heads, *, s_tile, out_dtype):
    B, S, K = x.shape
    H, _, three_d = w_heads.shape
    D = three_d // 3
    out_sds = jax.ShapeDtypeStruct((B, H, S, D), out_dtype)
    return pl.pallas_call(
        _qkv_proj_kernel,
        out_shape=(out_sds, out_sds, out_sds),
        grid=(B, S // s_tile, H),
        in_specs=[
            pl.BlockSpec((None, s_tile, K), lambda b, i, h: (b, i, 0)),     # activations
            pl.BlockSpec((H, K, three_d), lambda b, i, h: (0, 0, 0)),       # weights (resident)
            pl.BlockSpec((H, 1, three_d), lambda b, i, h: (0, 0, 0)),       # bias    (resident)
        ],
        out_specs=(
            pl.BlockSpec((None, None, s_tile, D), lambda b, i, h: (b, h, i, 0)),
            pl.BlockSpec((None, None, s_tile, D), lambda b, i, h: (b, h, i, 0)),
            pl.BlockSpec((None, None, s_tile, D), lambda b, i, h: (b, h, i, 0)),
        ),
        compiler_params=pltpu.CompilerParams(
            dimension_semantics=("parallel", "parallel", "arbitrary"),
            vmem_limit_bytes=_vmem_limit_bytes()),
    )(x, w_heads, b_heads)


# ------------------------------ flash attention kernel ------------------------------

def _flash_kernel(q_ref, k_ref, v_ref, mask_ref, o_ref, m_sc, l_sc, acc_sc):
    qi = pl.program_id(2)
    ki = pl.program_id(3)
    nk = pl.num_programs(3)

    hb, q_tile, d = q_ref.shape
    kv_tile = k_ref.shape[1]
    q_start = qi * q_tile
    kv_start = ki * kv_tile

    @pl.when(ki == 0)
    def _init():
        m_sc[...] = jnp.full_like(m_sc, -jnp.inf)
        l_sc[...] = jnp.zeros_like(l_sc)
        acc_sc[...] = jnp.zeros_like(acc_sc)

    is_computed = kv_start <= q_start + (q_tile - 1)      # not fully in the causal future
    needs_mask = kv_start + (kv_tile - 1) > q_start       # tile straddles the diagonal

    def update(apply_causal_mask):
        # q already carries the 1/sqrt(D) scale (folded into W_q host-side).
        s = jnp.einsum("hqd,hkd->hqk", q_ref[...], k_ref[...],
                       preferred_element_type=jnp.float32)          # [hb, q, kv] f32
        start = pl.multiple_of(ki * kv_tile, kv_tile)
        amask = mask_ref[:, pl.ds(start, kv_tile)].astype(jnp.float32)   # [1, kv]
        s = s + amask[None, :, :]
        if apply_causal_mask:   # only the diagonal-straddling tiles pay the iota/select
            row = q_start + lax.broadcasted_iota(jnp.int32, (q_tile, kv_tile), 0)
            col = kv_start + lax.broadcasted_iota(jnp.int32, (q_tile, kv_tile), 1)
            s = jnp.where((row >= col)[None, :, :], s, jnp.float32(_MASK_VALUE))

        m_prev = m_sc[...]
        m_new = jnp.maximum(m_prev, jnp.max(s, axis=-1, keepdims=True))
        alpha = jnp.exp(m_prev - m_new)
        p = jnp.exp(s - m_new)
        l_sc[...] = alpha * l_sc[...] + jnp.sum(p, axis=-1, keepdims=True)
        acc_sc[...] = alpha * acc_sc[...] + jnp.einsum(
            "hqk,hkd->hqd", p.astype(v_ref.dtype), v_ref[...],
            preferred_element_type=jnp.float32)
        m_sc[...] = m_new

    @pl.when(jnp.logical_and(is_computed, needs_mask))
    def _masked():
        update(True)

    @pl.when(jnp.logical_and(is_computed, jnp.logical_not(needs_mask)))
    def _unmasked():
        update(False)

    @pl.when(ki == nk - 1)
    def _finalize():
        inv_l = pl.reciprocal(l_sc[...], approx=True)
        o_ref[...] = (acc_sc[...] * inv_l).astype(o_ref.dtype)


def _flash_attention(q, k, v, attn_mask, *, q_tile, kv_tile, h_block):
    B, H, S, D = q.shape
    hb = h_block
    grid = (B, H // hb, S // q_tile, S // kv_tile)

    def q_map(b, g, qi, ki):
        return (b, g, qi, 0)

    def kv_map(b, g, qi, ki):
        # Clamp to the last causally-needed kv block: fully-future K/V tiles are never
        # re-DMA'd (block index repeats, so the copy is elided).
        last = (qi * q_tile + (q_tile - 1)) // kv_tile
        return (b, g, jnp.minimum(ki, last), 0)

    return pl.pallas_call(
        _flash_kernel,
        out_shape=jax.ShapeDtypeStruct((B, H, S, D), q.dtype),
        grid=grid,
        in_specs=[
            pl.BlockSpec((None, hb, q_tile, D), q_map),
            pl.BlockSpec((None, hb, kv_tile, D), kv_map),
            pl.BlockSpec((None, hb, kv_tile, D), kv_map),
            pl.BlockSpec((None, 1, S), lambda b, g, qi, ki: (b, 0, 0)),  # resident mask row
        ],
        out_specs=pl.BlockSpec((None, hb, q_tile, D), q_map),
        scratch_shapes=[
            pltpu.VMEM((hb, q_tile, 1), jnp.float32),   # running max m
            pltpu.VMEM((hb, q_tile, 1), jnp.float32),   # running sum l
            pltpu.VMEM((hb, q_tile, D), jnp.float32),   # output accumulator
        ],
        compiler_params=pltpu.CompilerParams(
            dimension_semantics=("parallel", "parallel", "parallel", "arbitrary"),
            vmem_limit_bytes=_vmem_limit_bytes()),
    )(q, k, v, attn_mask)


# ------------------------ output projection (fused head merge) ------------------------
# grid (B, S_tiles, H) with H as an "arbitrary" reduction axis; ctx consumed directly in
# [B, H, S, D]; W_proj reshaped host-side to [H, D, E] and kept resident; f32 accumulator.

def _out_proj_kernel(ctx_ref, w_ref, b_ref, o_ref, acc_ref):
    h = pl.program_id(2)

    @pl.when(h == 0)
    def _init():
        acc_ref[...] = jnp.zeros_like(acc_ref)

    acc_ref[...] += jnp.dot(ctx_ref[...], w_ref[h],
                            preferred_element_type=jnp.float32)

    @pl.when(h == pl.num_programs(2) - 1)
    def _finalize():
        o_ref[...] = (acc_ref[...] + b_ref[...].astype(jnp.float32)).astype(o_ref.dtype)


def _out_projection(ctx, w_heads, bias, *, s_tile, out_dtype):
    B, H, S, D = ctx.shape
    E = w_heads.shape[-1]
    return pl.pallas_call(
        _out_proj_kernel,
        out_shape=jax.ShapeDtypeStruct((B, S, E), out_dtype),
        grid=(B, S // s_tile, H),
        in_specs=[
            pl.BlockSpec((None, None, s_tile, D), lambda b, i, h: (b, h, i, 0)),
            pl.BlockSpec((H, D, E), lambda b, i, h: (0, 0, 0)),   # weight (resident)
            pl.BlockSpec((1, E), lambda b, i, h: (0, 0)),         # bias   (resident)
        ],
        out_specs=pl.BlockSpec((None, s_tile, E), lambda b, i, h: (b, i, 0)),
        scratch_shapes=[pltpu.VMEM((s_tile, E), jnp.float32)],
        compiler_params=pltpu.CompilerParams(
            dimension_semantics=("parallel", "parallel", "arbitrary"),
            vmem_limit_bytes=_vmem_limit_bytes()),
    )(ctx, w_heads, bias)


# --------------------------------- parameter prep ---------------------------------

def _prepare_params(params, *, n_head, compute_dtype=jnp.bfloat16):
    """One-time host-side rearrangement of the Conv1D weights into per-head slabs."""
    w_qkv = params["w_qkv"]                       # [E, 3E]
    b_qkv = params["b_qkv"].reshape(1, -1)        # [1, 3E]
    w_proj = params["w_proj"]                     # [E, E]
    b_proj = params["b_proj"].reshape(1, -1)      # [1, E]
    E = w_qkv.shape[0]
    H = n_head
    D = E // H
    scale = 1.0 / math.sqrt(D)

    wq, wk, wv = jnp.split(w_qkv, 3, axis=1)      # each [E, E]
    bq, bk, bv = jnp.split(b_qkv, 3, axis=1)      # each [1, E]
    wq = wq * scale                               # fold softmax scale into Q projection
    bq = bq * scale

    def heads_w(w):   # [E, E] -> [H, E, D]
        return w.reshape(E, H, D).transpose(1, 0, 2)

    def heads_b(b):   # [1, E] -> [H, 1, D]
        return b.reshape(1, H, D).transpose(1, 0, 2)

    w_qkv_heads = jnp.concatenate([heads_w(wq), heads_w(wk), heads_w(wv)], axis=-1)  # [H,E,3D]
    b_qkv_heads = jnp.concatenate([heads_b(bq), heads_b(bk), heads_b(bv)], axis=-1)  # [H,1,3D]
    w_proj_heads = w_proj.reshape(H, D, E)                                           # [H,D,E]

    return {
        "w_qkv_heads": w_qkv_heads.astype(compute_dtype),
        "b_qkv_heads": b_qkv_heads.astype(jnp.float32),
        "w_proj_heads": w_proj_heads.astype(compute_dtype),
        "b_proj": b_proj.astype(jnp.float32),
    }


# ------------------------------------ wrapper ------------------------------------

def expert_attention_common(hidden_states, attention_mask, params, *, n_head,
                            q_tile=None, kv_tile=None):
    """hidden_states: [B, S, E]; attention_mask: additive [B, 1, S] (0 keep, -1e4 mask)."""
    B, S, E = hidden_states.shape
    assert E % n_head == 0
    H = n_head
    D = E // H

    s_tile = _pick_seq_tile(S)
    q_tile = q_tile or _pick_seq_tile(S, (256, 128))
    kv_tile = kv_tile or _pick_seq_tile(S, (512, 256, 128))
    assert S % s_tile == 0 and S % q_tile == 0 and S % kv_tile == 0
    hb = _pick_head_block(H, D)

    prep = _prepare_params(params, n_head=n_head)

    # 1) Fused QKV projection -> q/k/v head-major [B, H, S, D] in bf16 (scale folded).
    q, k, v = _qkv_projection(hidden_states, prep["w_qkv_heads"], prep["b_qkv_heads"],
                              s_tile=s_tile, out_dtype=jnp.bfloat16)

    # 2) Flash attention: online softmax, causal skip (+ clamped K/V DMA), head blocking.
    ctx = _flash_attention(q, k, v, attention_mask.astype(jnp.float32),
                           q_tile=q_tile, kv_tile=kv_tile, h_block=hb)

    # 3) Output projection consuming [B, H, S, D] via an H reduction axis (fused merge).
    return _out_projection(ctx, prep["w_proj_heads"], prep["b_proj"],
                           s_tile=s_tile, out_dtype=hidden_states.dtype)


# ----------------------------------- reference ------------------------------------

def _reference(hidden_states, attention_mask, params, *, n_head):
    B, S, E = hidden_states.shape
    D = E // n_head
    qkv = hidden_states @ params["w_qkv"] + params["b_qkv"].reshape(1, -1)
    q, k, v = jnp.split(qkv, 3, axis=-1)

    def heads(t):
        return t.reshape(B, S, n_head, D).transpose(0, 2, 1, 3)   # [B,H,S,D]

    q, k, v = heads(q), heads(k), heads(v)
    s = jnp.einsum("bhqd,bhkd->bhqk", q, k) / jnp.sqrt(float(D))
    causal = jnp.tril(jnp.ones((S, S), bool))
    s = jnp.where(causal[None, None], s, _MASK_VALUE)
    s = s + attention_mask[:, None, :, :]                         # [B,1,1,S]
    p = jax.nn.softmax(s, axis=-1)
    ctx = jnp.einsum("bhqk,bhkd->bhqd", p, v).transpose(0, 2, 1, 3).reshape(B, S, E)
    return ctx @ params["w_proj"] + params["b_proj"].reshape(1, -1)


def _make_params(key, E):
    k1, k2, k3, k4 = jax.random.split(key, 4)
    return {
        "w_qkv": 0.02 * jax.random.normal(k1, (E, 3 * E), jnp.float32),
        "b_qkv": 0.01 * jax.random.normal(k3, (1, 3 * E), jnp.float32),
        "w_proj": 0.02 * jax.random.normal(k2, (E, E), jnp.float32),
        "b_proj": 0.01 * jax.random.normal(k4, (1, E), jnp.float32),
    }


def _check(out, ref, name):
    err = jnp.max(jnp.abs(out - ref))
    ok = jnp.allclose(out, ref, atol=2e-3, rtol=2e-2)
    assert bool(ok), f"mismatch vs reference ({name}): max abs err {err}"


if __name__ == "__main__":
    key = jax.random.PRNGKey(0)
    kp, kx1, kx2 = jax.random.split(key, 3)

    # ---- test 1: small shapes, single tile ------------------------------------------
    B, S, E, H = 2, 8, 32, 4
    params = _make_params(kp, E)
    x = jax.random.normal(kx1, (B, S, E), jnp.float32)
    # batch 0: attend to everything; batch 1: last two key positions padded out
    pad = jnp.array([[0] * S, [0] * (S - 2) + [1, 1]], jnp.float32)   # [B, S]
    mask = (pad * _MASK_VALUE)[:, None, :]                            # [B, 1, S] additive

    out = expert_attention_common(x, mask, params, n_head=H)
    jax.block_until_ready(out)
    ref = _reference(x, mask, params, n_head=H)
    assert out.shape == (B, S, E)
    _check(out, ref, "test 1")

    # ---- test 2: multi-tile path (online softmax accumulation + causal tile skip) ----
    B2, S2 = 1, 256
    x2 = jax.random.normal(kx2, (B2, S2, E), jnp.float32)
    pad2 = jnp.zeros((B2, S2), jnp.float32).at[:, -5:].set(1.0)
    mask2 = (pad2 * _MASK_VALUE)[:, None, :]
    out2 = expert_attention_common(x2, mask2, params, n_head=H, q_tile=128, kv_tile=128)
    jax.block_until_ready(out2)
    ref2 = _reference(x2, mask2, params, n_head=H)
    _check(out2, ref2, "test 2")

    print("KERNEL_OK")
</pallas_src>

<mosaic_0001>
module attributes {stable_mosaic.version = 11 : i64} {
  func.func @_qkv_proj_kernel(%arg0: i32, %arg1: i32, %arg2: i32, %arg3: memref<1x8x32xf32, #tpu.memory_space<vmem>>, %arg4: memref<4x32x24xbf16, #tpu.memory_space<vmem>>, %arg5: memref<4x1x24xf32, #tpu.memory_space<vmem>>, %arg6: memref<1x1x8x8xbf16, #tpu.memory_space<vmem>>, %arg7: memref<1x1x8x8xbf16, #tpu.memory_space<vmem>>, %arg8: memref<1x1x8x8xbf16, #tpu.memory_space<vmem>>) attributes {dimension_semantics = [#tpu.dimension_semantics<parallel>, #tpu.dimension_semantics<parallel>, #tpu.dimension_semantics<arbitrary>], iteration_bounds = array<i64: 2, 1, 4>, scalar_prefetch = 0 : i64, scratch_operands = 0 : i64, tpu.core_type = #tpu.core_type<tc>, window_params = [{transform_indices = @transform_0, window_bounds = array<i64: 1, 8, 32>}, {pipeline_mode = #tpu.pipeline_mode<synchronous>, transform_indices = @transform_1, window_bounds = array<i64: 4, 32, 24>}, {pipeline_mode = #tpu.pipeline_mode<synchronous>, transform_indices = @transform_2, window_bounds = array<i64: 4, 1, 24>}, {transform_indices = @transform_3, window_bounds = array<i64: 1, 1, 8, 8>}, {transform_indices = @transform_4, window_bounds = array<i64: 1, 1, 8, 8>}, {transform_indices = @transform_5, window_bounds = array<i64: 1, 1, 8, 8>}]} {
    %c0 = arith.constant 0 : index
    %c0_0 = arith.constant 0 : index
    %c0_1 = arith.constant 0 : index
    %0 = vector.load %arg3[%c0, %c0_0, %c0_1] : memref<1x8x32xf32, #tpu.memory_space<vmem>>, vector<1x8x32xf32>
    %1 = vector.shape_cast %0 : vector<1x8x32xf32> to vector<8x32xf32>
    %2 = arith.truncf %1 : vector<8x32xf32> to vector<8x32xbf16>
    %3 = arith.index_cast %arg2 : i32 to index
    %c0_2 = arith.constant 0 : index
    %c0_3 = arith.constant 0 : index
    %4 = vector.load %arg4[%3, %c0_2, %c0_3] : memref<4x32x24xbf16, #tpu.memory_space<vmem>>, vector<1x32x24xbf16>
    %5 = vector.shape_cast %4 : vector<1x32x24xbf16> to vector<32x24xbf16>
    %cst = arith.constant dense<0.000000e+00> : vector<8x24xf32>
    %6 = tpu.matmul %2, %5, %cst {dimension_numbers = #tpu.dot_dimension_numbers<[1], [0], [0], [1], [0, 0, 1, 1], [], []>} : vector<8x32xbf16>, vector<32x24xbf16>, vector<8x24xf32> -> vector<8x24xf32>
    %7 = arith.index_cast %arg2 : i32 to index
    %c0_4 = arith.constant 0 : index
    %c0_5 = arith.constant 0 : index
    %8 = vector.load %arg5[%7, %c0_4, %c0_5] : memref<4x1x24xf32, #tpu.memory_space<vmem>>, vector<1x1x24xf32>
    %9 = vector.shape_cast %8 : vector<1x1x24xf32> to vector<1x24xf32>
    %10 = vector.broadcast %9 : vector<1x24xf32> to vector<8x24xf32>
    %11 = arith.addf %6, %10 : vector<8x24xf32>
    %12 = vector.extract_strided_slice %11 {offsets = [0, 0], sizes = [8, 8], strides = [1, 1]} : vector<8x24xf32> to vector<8x8xf32>
    %13 = arith.truncf %12 : vector<8x8xf32> to vector<8x8xbf16>
    %c0_6 = arith.constant 0 : index
    %c0_7 = arith.constant 0 : index
    %c0_8 = arith.constant 0 : index
    %c0_9 = arith.constant 0 : index
    %14 = vector.load %arg6[%c0_6, %c0_7, %c0_8, %c0_9] : memref<1x1x8x8xbf16, #tpu.memory_space<vmem>>, vector<1x1x8x8xbf16>
    %15 = vector.shape_cast %14 : vector<1x1x8x8xbf16> to vector<8x8xbf16>
    %16 = vector.shape_cast %13 : vector<8x8xbf16> to vector<1x1x8x8xbf16>
    tpu.vector_store %arg6[%c0_6, %c0_7, %c0_8, %c0_9], %16 {strides = array<i32>} : memref<1x1x8x8xbf16, #tpu.memory_space<vmem>>, vector<1x1x8x8xbf16>,
    %17 = vector.extract_strided_slice %11 {offsets = [0, 8], sizes = [8, 8], strides = [1, 1]} : vector<8x24xf32> to vector<8x8xf32>
    %18 = arith.truncf %17 : vector<8x8xf32> to vector<8x8xbf16>
    %c0_10 = arith.constant 0 : index
    %c0_11 = arith.constant 0 : index
    %c0_12 = arith.constant 0 : index
    %c0_13 = arith.constant 0 : index
    %19 = vector.load %arg7[%c0_10, %c0_11, %c0_12, %c0_13] : memref<1x1x8x8xbf16, #tpu.memory_space<vmem>>, vector<1x1x8x8xbf16>
    %20 = vector.shape_cast %19 : vector<1x1x8x8xbf16> to vector<8x8xbf16>
    %21 = vector.shape_cast %18 : vector<8x8xbf16> to vector<1x1x8x8xbf16>
    tpu.vector_store %arg7[%c0_10, %c0_11, %c0_12, %c0_13], %21 {strides = array<i32>} : memref<1x1x8x8xbf16, #tpu.memory_space<vmem>>, vector<1x1x8x8xbf16>,
    %22 = vector.extract_strided_slice %11 {offsets = [0, 16], sizes = [8, 8], strides = [1, 1]} : vector<8x24xf32> to vector<8x8xf32>
    %23 = arith.truncf %22 : vector<8x8xf32> to vector<8x8xbf16>
    %c0_14 = arith.constant 0 : index
    %c0_15 = arith.constant 0 : index
    %c0_16 = arith.constant 0 : index
    %c0_17 = arith.constant 0 : index
    %24 = vector.load %arg8[%c0_14, %c0_15, %c0_16, %c0_17] : memref<1x1x8x8xbf16, #tpu.memory_space<vmem>>, vector<1x1x8x8xbf16>
    %25 = vector.shape_cast %24 : vector<1x1x8x8xbf16> to vector<8x8xbf16>
    %26 = vector.shape_cast %23 : vector<8x8xbf16> to vector<1x1x8x8xbf16>
    tpu.vector_store %arg8[%c0_14, %c0_15, %c0_16, %c0_17], %26 {strides = array<i32>} : memref<1x1x8x8xbf16, #tpu.memory_space<vmem>>, vector<1x1x8x8xbf16>,
    return
  }
  func.func @transform_0(%arg0: i32, %arg1: i32, %arg2: i32) -> (i32, i32, i32) {
    %c0_i32 = arith.constant 0 : i32
    %c0_i32_0 = arith.constant 0 : i32
    return %arg0, %arg1, %c0_i32 : i32, i32, i32
  }
  func.func @transform_1(%arg0: i32, %arg1: i32, %arg2: i32) -> (i32, i32, i32) {
    %c0_i32 = arith.constant 0 : i32
    %c0_i32_0 = arith.constant 0 : i32
    %c0_i32_1 = arith.constant 0 : i32
    %c0_i32_2 = arith.constant 0 : i32
    return %c0_i32, %c0_i32_0, %c0_i32_1 : i32, i32, i32
  }
  func.func @transform_2(%arg0: i32, %arg1: i32, %arg2: i32) -> (i32, i32, i32) {
    %c0_i32 = arith.constant 0 : i32
    %c0_i32_0 = arith.constant 0 : i32
    %c0_i32_1 = arith.constant 0 : i32
    %c0_i32_2 = arith.constant 0 : i32
    return %c0_i32, %c0_i32_0, %c0_i32_1 : i32, i32, i32
  }
  func.func @transform_3(%arg0: i32, %arg1: i32, %arg2: i32) -> (i32, i32, i32, i32) {
    %c0_i32 = arith.constant 0 : i32
    %c0_i32_0 = arith.constant 0 : i32
    return %arg0, %arg2, %arg1, %c0_i32 : i32, i32, i32, i32
  }
  func.func @transform_4(%arg0: i32, %arg1: i32, %arg2: i32) -> (i32, i32, i32, i32) {
    %c0_i32 = arith.constant 0 : i32
    %c0_i32_0 = arith.constant 0 : i32
    return %arg0, %arg2, %arg1, %c0_i32 : i32, i32, i32, i32
  }
  func.func @transform_5(%arg0: i32, %arg1: i32, %arg2: i32) -> (i32, i32, i32, i32) {
    %c0_i32 = arith.constant 0 : i32
    %c0_i32_0 = arith.constant 0 : i32
    return %arg0, %arg2, %arg1, %c0_i32 : i32, i32, i32, i32
  }
}

</mosaic_0001>

<bundles_post_ra>
// kernel: tpu_custom_call.1
= control target key start
LH: loop header
LB: loop body
LE: loop exit
PB: predicated region body
PF: predicated region fallthrough
CT: control target
= control target key end

     0   :  { %s1038_s0 = inlined_call_operand.vmem [shape: f32[2,8,32], index: 0, kind: input, shape index: {}]   ;;  %s1039_s1 = inlined_call_operand.vmem [shape: bf16[4,32,24], index: 1, kind: input, shape index: {}]   ;;  %s1040_s2 = inlined_call_operand.vmem [shape: f32[4,1,24], index: 2, kind: input, shape index: {}]   ;;  %s1041_s3 = inlined_call_operand.hbm [shape: bf16[2,4,8,8], index: 3, kind: output, shape index: {0}]   ;;  %s1042_s4 = inlined_call_operand.hbm [shape: bf16[2,4,8,8], index: 4, kind: output, shape index: {1}]   ;;  %s1043_s5 = inlined_call_operand.hbm [shape: bf16[2,4,8,8], index: 5, kind: output, shape index: {2}]  }
   0x1   :  { %1046 = sst [smem:[#allocation9_spill]] %s1038_s0 }
   0x2   :  { %1047 = sst [smem:[#allocation10_spill]] %s1039_s1 }
   0x3   :  { %1048 = sst [smem:[#allocation11_spill]] %s1040_s2 }
   0x4   :  { %11 = vsyncpa [#allocation3], 0 }
   0x5   :  { %13 = vsyncpa [#allocation3 + $0x1], 0 }
   0x6   :  { %14 = vsyncpa [#allocation5], 0 }
   0x7   :  { %16 = vsyncpa [#allocation5 + $0x1], 0  ;;  %s856_s18 = smov 0   ;;  %s858_s19 = smov 0  }
   0x8   :  { %s860_s20 = smov 0   ;;  %s862_s21 = smov 0  }
   0x9   :  { %s864_s22 = smov 0   ;;  %s866_s23 = smov 0  }
   0xa   :  { %s868_s24 = smov 0   ;;  %s870_s25 = smov 0  }
   0xb LB: > { %s1045_s26 = sadd.s32 4294967295, %s822_s25   ;;  %s1044_s27 = sadd.s32 4294967294, %s822_s25   ;;  %s822_s25 = sphi %s870_s25, %s22_s25   ;;  %s818_s24 = sphi %s868_s24, %s1062_s24   ;;  %s814_s23 = sphi %s866_s23, %s1061_s23   ;;  %s810_s22 = sphi %s864_s22, %s1060_s22   ;;  %s806_s21 = sphi %s862_s21, %s1059_s21   ;;  %s802_s20 = sphi %s860_s20, %s1058_s20   ;;  %s798_s19 = sphi %s858_s19, %s1057_s19   ;;  %s794_s18 = sphi %s856_s18, %s1056_s18  }
   0xc   : > { %s34_s28 = sadd.s32 1, %s814_s23  ;;  %s41_s29 = sadd.s32 1, %s818_s24 }
   0xd   : > { %p35_p0 = scmp.ge.s32.totalorder %s34_s28, 4  ;;  %p132_p1 = scmp.ne.s32.totalorder %s802_s20, %s798_s19 }
   0xe   : > { %p133_p2 = scmp.eq.s32.totalorder %s1045_s26, 7  ;;  %p138_p5 = scmp.ne.s32.totalorder %s798_s19, %s794_s18 }
   0xf   : > { %s1064_s28 = smov (%p35_p0, %s34_s28), 0  ;;  %s1066_s29 = smov (!%p35_p0, %s41_s29), %s818_s24 }
  0x10   : > { %s116_s30 = ssub.s32 %s814_s23, %s1064_s28  ;;  %p909_p3 = por %p133_p2, %p132_p1 }
  0x11   : > { %p43_p4 = scmp.ge.s32.totalorder %s1066_s29, 2  ;;  %p139_p6 = scmp.eq.s32.totalorder %s1044_s27, 7 }
  0x12   : > { %p554_p7 = scmp.ge.s32.totalorder %s822_s25, 1  ;;  %p233_p9 = scmp.lt.s32.totalorder %s822_s25, 9 }
  0x13   : > { %s1068_s29 = smov (%p43_p4, %s1066_s29), 0  ;;  %p920_p8 = por %p139_p6, %p138_p5 }
  0x14   : > { %s115_s8 = ssub.s32 %s818_s24, %s1068_s29  ;;  %s122_s9 = sadd.s32 1, %s802_s20 }
  0x15   : > { %s117_s10 = sor.u32 %s116_s30, %s115_s8  ;;  %p234_p10 = pnand %p554_p7, %p233_p9 }
  0x16   : > { %p120_p11 = scmp.eq.s32.totalorder %s117_s10, 0  ;;  %s581_s12 = sshll.u32 (!%p234_p10), %s806_s21, 4 }
  0x17   : > { %237 = sbr.rel (%p234_p10) target bundleno = 301 (0x12d), region = 32  ;;  %p273_p12 = scmp.lt.s32.totalorder (!%p234_p10), %s810_s22, 1 }
  0x18   : > { %s929_s11 = scalar_select %p120_p11, %s802_s20, %s122_s9  }
  0x19   : > { %s1051_s1 = sld [smem:[#allocation10_spill]] (!%p234_p10)  ;;  %s256_s13 = sand.u32 (!%p234_p10), 1, %s798_s19  }
  0x1a   : > { %s1052_s2 = sld [smem:[#allocation11_spill]] (!%p234_p10)  ;;  %s947_s16 = sshll.u32 (!%p234_p10), %s256_s13, 2 }
  0x1b   : > { %s1053_s0 = sld [smem:[#allocation9_spill]] (!%p234_p10)  ;;  %s688_s27 = scalar_lea.hbm (!%p234_p10), %s1041_s3, 32 }
  0x1c   : > { %s274_s8 = scalar_select %p273_p12, %s810_s22, 1  ;;  %vm307_vm0 = vcmask 261120   ;;  %vm325_vm1 = vcmask 60416  }
  0x1e   : > { %s558_s9 = sshll.u32 %s274_s8, 3  ;;  %s258_s8 = scalar_lea.vmem [#allocation2], %s947_s16 }
  0x1f   : > { %s285_s15 = scalar_lea.vmem %s1051_s1, %s581_s12  ;;  %s573_s12 = sshll.u32 %s810_s22, 2 }
  0x20   : > { %s290_s30 = scalar_lea.vmem %s1052_s2, %s806_s21  ;;  %v583_v0 = vld [vmem:[%s285_s15 + $0x8] sm:$0xff]  ;;  %v582_v1 = vld [vmem:[%s285_s15] sm:$0xff]  ;;  %s358_s14 = sadd.s32 %s806_s21, %s573_s12 }
  0x21   : > { %317 = vmatpush.bf16.msra.mxu0 %v583_v0  ;;  %s279_s26 = scalar_lea.vmem %s1053_s0, %s558_s9  ;;  %v667_v4 = vld [vmem:[%s290_s30] ss:$0 sm:$0xff]  ;;  %s949_s17 = sshll.u32 %s358_s14, 2 }
  0x22   : > { %v281_v2 = vld [vmem:[%s279_s26] sm:$0xff]  ;;  %s360_s15 = scalar_lea.hbm %s1041_s3, %s949_s17  ;;  %s362_s22 = sshll.u32 %s258_s8, 4  ;;  %s363_s22 = int_to_ptr.vmem [resolvable:$true] %s362_s22 }
  0x23   : > { %v282_v3 = vpack.c.bf16 %v281_v2, %v281_v2  ;;  %s364_s30 = sshll.u32 %s360_s15, 4  ;;  %s824_s21 = smov 120   ;;  %s365_s30 = int_to_ptr.hbm [resolvable:$true] %s364_s30 }
  0x24   : > { %s337_s9 = scalar_lea.sflag [#allocation3], %s256_s13  ;;  %s682_s10 = sshra.s32 %s365_s30, 4  ;;  %s683_s10 = int_to_ptr.hbm [resolvable:$true] %s682_s10 }
  0x25   : > { %318 = vmatpush.bf16.msra.mxu0 %v582_v1  ;;  %s684_s12 = scalar_lea.hbm %s683_s10, 4  ;;  %p689_p2 = scmp.lt.s32.totalorder %s683_s10, %s1041_s3 }
  0x26   : > { %p685_p13 = scmp.ne.s32.totalorder %s683_s10, %s684_s12  ;;  %p690_p4 = scmp.lt.s32.totalorder %s688_s27, %s684_s12 }
  0x28   : > { %569 = vmatmul.msk.bf16.vlgmr.msra.gmra.mxu0 %vm307_vm0, %v282_v3  ;;  %p686_p0 = pnand %p685_p13, %p909_p3  ;;  %p691_p5 = por %p690_p4, %p689_p2 }
  0x2a   : > { %p687_p1 = pneg %p686_p0 }
  0x2c   : > { %p692_p6 = pnand %p691_p5, %p687_p1 }
  0xa5   : > { %v320_v5 = vpop.f32.mrf.mxu0 }
  0xa6   : > { %v321_v6 = vadd.f32 %v667_v4, %v320_v5 }
  0xa8   : > { %v324_v7 = vpack.c.bf16 %v321_v6, %v321_v6 }
  0xaa   : > { %328 = vrot.lane.b32.xlu0 %v324_v7, %s824_s21  ;;  %326 = vst.msk [vmem:[%s258_s8] sm:$0xf] %vm325_vm1, %v324_v7 }
  0xab   : > { %695 = shalt.err (!%p692_p6)
}
  0xac   : > { %584 = dma.vmem_to_hbm [thread:$0]  (%p909_p3), %s363_s22, 64, %s365_s30, %s337_s9  }
  0xad   : > { %v322_v8 = vpop.f32.mrf.mxu0  ;;  %s825_s13 = smov 112   ;;  %s377_s0 = scalar_lea.hbm %s1042_s4, %s949_s17 }
  0xae   : > { %s1054_s1 = sadd.s32 4294967295, %s822_s25   ;;  %s265_s10 = scalar_lea.vmem [#allocation4], %s947_s16 }
  0xaf   : > { %s973_s21 = sand.u32 1, %s1054_s1   ;;  %s379_s12 = sshll.u32 %s265_s10, 4  ;;  %s380_s12 = int_to_ptr.vmem [resolvable:$true] %s379_s12 }
  0xb0   : > { %s381_s14 = sshll.u32 %s377_s0, 4  ;;  %s394_s9 = scalar_lea.hbm %s1043_s5, %s949_s17  ;;  %s382_s14 = int_to_ptr.hbm [resolvable:$true] %s381_s14 }
  0xb1   : > { %s342_s26 = scalar_lea.sflag [#allocation5], %s973_s21  ;;  %s710_s27 = sshra.s32 %s382_s14, 4  ;;  %s711_s27 = int_to_ptr.hbm [resolvable:$true] %s710_s27 }
  0xb2   : > { %332 = vrot.lane.b32.xlu0 %v324_v7, %s825_s13  ;;  %s712_s13 = scalar_lea.hbm %s711_s27, 4  ;;  %s716_s0 = scalar_lea.hbm %s1042_s4, 32 }
  0xb3   : > { %p713_p7 = scmp.ne.s32.totalorder %s711_s27, %s712_s13  ;;  %p717_p11 = scmp.lt.s32.totalorder %s711_s27, %s1042_s4 }
  0xb4   : > { %p718_p12 = scmp.lt.s32.totalorder %s716_s0, %s712_s13 }
  0xb5   : > { %p714_p9 = pnand %p713_p7, %p909_p3 }
  0xb6   : > { %p719_p13 = por %p718_p12, %p717_p11 }
  0xb7   : > { %p715_p10 = pneg %p714_p9 }
  0xb9   : > { %p720_p0 = pnand %p719_p13, %p715_p10 }
 0x11c   : > { %v329_v9 = vpop.permute.xlu0 %328 }
 0x11d   : > { %331 = vst.msk [vmem:[%s265_s10] sm:$0xf] %vm325_vm1, %v329_v9 }
 0x11e   : > { %723 = shalt.err (!%p720_p0)
}
 0x11f   : > { %585 = dma.vmem_to_hbm [thread:$0]  (%p909_p3), %s380_s12, 64, %s382_s14, %s342_s26  }
 0x120   : > { %s272_s17 = scalar_lea.vmem [#allocation6], %s947_s16  ;;  %s398_s22 = sshll.u32 %s394_s9, 4  ;;  %s399_s22 = int_to_ptr.hbm [resolvable:$true] %s398_s22 }
 0x121   : > { %s396_s10 = sshll.u32 %s272_s17, 4  ;;  %s738_s2 = sshra.s32 %s399_s22, 4  ;;  %s397_s10 = int_to_ptr.vmem [resolvable:$true] %s396_s10  ;;  %s739_s2 = int_to_ptr.hbm [resolvable:$true] %s738_s2 }
 0x122   : > { %s740_s30 = scalar_lea.hbm %s739_s2, 4  ;;  %s744_s15 = scalar_lea.hbm %s1043_s5, 32 }
 0x123   : > { %p741_p1 = scmp.ne.s32.totalorder %s739_s2, %s740_s30  ;;  %p745_p5 = scmp.lt.s32.totalorder %s739_s2, %s1043_s5 }
 0x124   : > { %v333_v10 = vpop.permute.xlu0 %332  ;;  %p746_p6 = scmp.lt.s32.totalorder %s744_s15, %s740_s30 }
 0x125   : > { %335 = vst.msk [vmem:[%s272_s17] sm:$0xf] %vm325_vm1, %v333_v10  ;;  %p742_p2 = pnand %p741_p1, %p909_p3 }
 0x126   : > { %p747_p7 = por %p746_p6, %p745_p5 }
 0x127   : > { %p743_p4 = pneg %p742_p2 }
 0x129   : > { %p748_p9 = pnand %p747_p7, %p743_p4 }
 0x12b   : > { %751 = shalt.err (!%p748_p9)
}
 0x12c   : > { %586 = dma.vmem_to_hbm [thread:$0]  (%p909_p3), %s397_s10, 64, %s399_s22, %s342_s26  }
 0x12d PF: > { %p600_p10 = scmp.ge.s32.totalorder %s822_s25, 2  ;;  %s410_s14 = sand.u32 1, %s794_s18  }
 0x12e   : > { %s411_s9 = scalar_lea.sflag [#allocation3], %s410_s14 }
 0x12f   : > { %p591_p11 = pnand %p600_p10, %p920_p8 }
 0x131   : > { %p592_p12 = pneg %p591_p11 }
 0x133   : > { %785 = dma.done.wait (%p592_p12), %s411_s9, 64  }
 0x134   : > { %787 = vsyncadd (%p592_p12), %s411_s9, 4294967232  ;;  %s1055_s8 = sadd.s32 4294967294, %s822_s25  }
 0x135   : > { %s420_s0 = sand.u32 1, %s1055_s8  }
 0x136   : > { %s421_s1 = scalar_lea.sflag [#allocation5], %s420_s0 }
 0x137   : > { %789 = dma.done.wait (%p592_p12), %s421_s1, 128  }
 0x138   : > { %791 = vsyncadd (%p592_p12), %s421_s1, 4294967168  ;;  %s22_s25 = sadd.s32 1, %s822_s25   ;;  %s1056_s18 = smov %s798_s19 }
 0x139   : > { %p19_p3 = scmp.ge.s32.totalorder %s22_s25, 10   ;;  %s1057_s19 = smov %s802_s20 }
 0x13a   : > { %s1058_s20 = smov %s929_s11  ;;  %s1059_s21 = smov %s814_s23 }
 0x13b   : > { %s1060_s22 = smov %s818_s24  ;;  %s1061_s23 = smov %s1064_s28 }
 0x13c   : > { %s1062_s24 = smov %s1068_s29  ;;  %21 = sbr.rel (!%p19_p3) target bundleno = 11 (0xb), region = 101 }
 0x141   :  { %437 = vsyncpa [#allocation3], 1 }
 0x142   :  { %439 = vsyncpa [#allocation3 + $0x1], 1 }
 0x143   :  { %440 = vsyncpa [#allocation5], 1 }
 0x144   :  { %442 = vsyncpa [#allocation5 + $0x1], 1 }

</bundles_post_ra>
